<compile_context>
chip_gen: v6e
topology: v6e:2x2x1
jax: 0.10.0
libtpu: 0.0.40
codegen_flags: <defaults>
</compile_context>

<pallas_src>
import functools

import jax
import jax.numpy as jnp
import numpy as np
from jax.experimental import pallas as pl
from jax.experimental.pallas import tpu as pltpu  # noqa: F401  (TPU backend)

EPS = 1e-5


def class_block_kernel(x_ref, w1_ref, wcd_ref, params_ref, out_ref):
    """x:(B,Din) w1:(Din,L) wcd:(L,C+D2) params:(3,W) out:(B,L+C+D2).

    params rows: 0 = gamma[:L], 1 = beta[:L], 2 = fused head bias[:C+D2].
    """
    L = w1_ref.shape[1]
    CD = wcd_ref.shape[1]

    # ----- add_block: Linear(input_dim -> linear), bias dropped (cancelled
    #       exactly by the BatchNorm mean subtraction) -----
    f0 = jnp.dot(x_ref[...], w1_ref[...],
                 preferred_element_type=jnp.float32)          # (B, L)

    # ----- add_block: BatchNorm1d (training-mode batch statistics) -----
    mean = jnp.mean(f0, axis=0, keepdims=True)                # (1, L)
    diff = f0 - mean
    var = jnp.mean(diff * diff, axis=0, keepdims=True)        # biased variance

    gamma = params_ref[0:1, :L]                               # (1, L)
    beta = params_ref[1:2, :L]                                # (1, L)
    bcd = params_ref[2:3, :CD]                                # (1, C+D2)

    scale = gamma * jax.lax.rsqrt(var + EPS)                  # (1, L) once
    f = diff * scale + beta                                   # (B, L)

    # ----- fused classifier + cls_direction: Linear(linear -> C+D2) -----
    heads = jnp.dot(f, wcd_ref[...],
                    preferred_element_type=jnp.float32) + bcd  # (B, C+D2)

    # ----- single lane-dense output slab: [ f | glogit | dlogit ] -----
    out_ref[...] = jnp.concatenate([f, heads], axis=-1)


@functools.partial(jax.jit, static_argnames=())
def class_block(x, w1, gamma, beta, wc, bc, wd, bd):
    B, _ = x.shape
    L = w1.shape[1]
    C = wc.shape[1]
    D2 = wd.shape[1]
    CD = C + D2

    # Fuse the two classifier heads into one weight / bias.
    wcd = jnp.concatenate([wc, wd], axis=1)                    # (L, C+D2)
    bcd = jnp.concatenate([bc.reshape(1, C), bd.reshape(1, D2)], axis=1)

    # Pack all small per-column vectors into one parameter array.
    W = max(L, CD)
    params = jnp.zeros((3, W), dtype=jnp.float32)
    params = params.at[0, :L].set(gamma.reshape(L))
    params = params.at[1, :L].set(beta.reshape(L))
    params = params.at[2, :CD].set(bcd.reshape(CD))

    out = pl.pallas_call(
        class_block_kernel,
        out_shape=jax.ShapeDtypeStruct((B, L + CD), jnp.float32),
        # Whole arrays fit comfortably in VMEM at these sizes -> full-array
        # blocks, no grid, no BlockSpecs needed.
    )(x, w1, wcd, params)

    f = out[:, :L]
    glogit = out[:, L:L + C]
    dlogit = out[:, L + C:]
    # return_f=True semantics: [glogit, f, dlogit]
    return glogit, f, dlogit


def reference(x, w1, b1, gamma, beta, wc, bc, wd, bd):
    f0 = x @ w1 + b1
    mean = jnp.mean(f0, axis=0, keepdims=True)
    var = jnp.mean((f0 - mean) ** 2, axis=0, keepdims=True)
    f = gamma * (f0 - mean) / jnp.sqrt(var + EPS) + beta
    return f @ wc + bc, f, f @ wd + bd


if __name__ == "__main__":
    # Shapes (small synthetic instance of the ClassBlock head)
    B, D_IN, LINEAR, CLASS_NUM = 8, 64, 32, 10

    key = jax.random.PRNGKey(0)
    kx, kw1, kg, kwc, kwd = jax.random.split(key, 5)

    # Input (pooled backbone features)
    x = jax.random.normal(kx, (B, D_IN), dtype=jnp.float32)

    # add_block Linear: kaiming_normal_(a=0, mode='fan_out') -> std=sqrt(2/out)
    w1 = jax.random.normal(kw1, (D_IN, LINEAR), dtype=jnp.float32) * jnp.sqrt(
        2.0 / LINEAR)
    b1 = jnp.zeros((1, LINEAR), dtype=jnp.float32)  # init.constant_(bias, 0.0)

    # BatchNorm1d: weight ~ N(1.0, 0.02), bias = 0
    gamma = (1.0 + 0.02 * jax.random.normal(kg, (LINEAR,), dtype=jnp.float32)
             ).reshape(1, LINEAR)
    beta = jnp.zeros((1, LINEAR), dtype=jnp.float32)

    # classifier Linear: normal std=0.001, bias = 0
    wc = 0.001 * jax.random.normal(kwc, (LINEAR, CLASS_NUM), dtype=jnp.float32)
    bc = jnp.zeros((1, CLASS_NUM), dtype=jnp.float32)

    # cls_direction Linear (use_posture=True): normal std=0.001, bias = 0
    wd = 0.001 * jax.random.normal(kwd, (LINEAR, 2), dtype=jnp.float32)
    bd = jnp.zeros((1, 2), dtype=jnp.float32)

    glogit, f, dlogit = class_block(x, w1, gamma, beta, wc, bc, wd, bd)
    jax.block_until_ready((glogit, f, dlogit))

    g_ref, f_ref, d_ref = reference(x, w1, b1, gamma, beta, wc, bc, wd, bd)
    np.testing.assert_allclose(np.asarray(glogit), np.asarray(g_ref),
                               rtol=1e-5, atol=1e-5)
    np.testing.assert_allclose(np.asarray(f), np.asarray(f_ref),
                               rtol=1e-5, atol=1e-4)
    np.testing.assert_allclose(np.asarray(dlogit), np.asarray(d_ref),
                               rtol=1e-5, atol=1e-5)

    print("KERNEL_OK")
</pallas_src>

<mosaic_0001>
module attributes {stable_mosaic.version = 11 : i64} {
  func.func @class_block_kernel(%arg0: memref<8x64xf32, #tpu.memory_space<vmem>>, %arg1: memref<64x32xf32, #tpu.memory_space<vmem>>, %arg2: memref<32x12xf32, #tpu.memory_space<vmem>>, %arg3: memref<3x32xf32, #tpu.memory_space<vmem>>, %arg4: memref<8x44xf32, #tpu.memory_space<vmem>>) attributes {dimension_semantics = [], scalar_prefetch = 0 : i64, scratch_operands = 0 : i64, tpu.core_type = #tpu.core_type<tc>} {
    %c0 = arith.constant 0 : index
    %c0_0 = arith.constant 0 : index
    %0 = vector.load %arg0[%c0, %c0_0] : memref<8x64xf32, #tpu.memory_space<vmem>>, vector<8x64xf32>
    %c0_1 = arith.constant 0 : index
    %c0_2 = arith.constant 0 : index
    %1 = vector.load %arg1[%c0_1, %c0_2] : memref<64x32xf32, #tpu.memory_space<vmem>>, vector<64x32xf32>
    %cst = arith.constant dense<0.000000e+00> : vector<8x32xf32>
    %2 = tpu.matmul %0, %1, %cst {dimension_numbers = #tpu.dot_dimension_numbers<[1], [0], [0], [1], [0, 0, 1, 1], [], []>} : vector<8x64xf32>, vector<64x32xf32>, vector<8x32xf32> -> vector<8x32xf32>
    %cst_3 = arith.constant dense<0.000000e+00> : vector<32xf32>
    %3 = vector.multi_reduction <add>, %2, %cst_3 [0] : vector<8x32xf32> to vector<32xf32>
    %4 = vector.shape_cast %3 : vector<32xf32> to vector<1x32xf32>
    %cst_4 = arith.constant 8.000000e+00 : f32
    %5 = vector.broadcast %cst_4 : f32 to vector<1x32xf32>
    %6 = arith.divf %4, %5 : vector<1x32xf32>
    %7 = vector.broadcast %6 : vector<1x32xf32> to vector<8x32xf32>
    %8 = arith.subf %2, %7 : vector<8x32xf32>
    %9 = arith.mulf %8, %8 : vector<8x32xf32>
    %cst_5 = arith.constant dense<0.000000e+00> : vector<32xf32>
    %10 = vector.multi_reduction <add>, %9, %cst_5 [0] : vector<8x32xf32> to vector<32xf32>
    %11 = vector.shape_cast %10 : vector<32xf32> to vector<1x32xf32>
    %cst_6 = arith.constant 8.000000e+00 : f32
    %12 = vector.broadcast %cst_6 : f32 to vector<1x32xf32>
    %13 = arith.divf %11, %12 : vector<1x32xf32>
    %c0_7 = arith.constant 0 : index
    %c0_8 = arith.constant 0 : index
    %14 = vector.load %arg3[%c0_7, %c0_8] : memref<3x32xf32, #tpu.memory_space<vmem>>, vector<1x32xf32>
    %c1 = arith.constant 1 : index
    %c0_9 = arith.constant 0 : index
    %15 = vector.load %arg3[%c1, %c0_9] : memref<3x32xf32, #tpu.memory_space<vmem>>, vector<1x32xf32>
    %c2 = arith.constant 2 : index
    %c0_10 = arith.constant 0 : index
    %16 = vector.load %arg3[%c2, %c0_10] : memref<3x32xf32, #tpu.memory_space<vmem>>, vector<1x12xf32>
    %cst_11 = arith.constant 9.99999974E-6 : f32
    %17 = vector.broadcast %cst_11 : f32 to vector<1x32xf32>
    %18 = arith.addf %13, %17 : vector<1x32xf32>
    %19 = math.rsqrt %18 : vector<1x32xf32>
    %20 = arith.mulf %14, %19 : vector<1x32xf32>
    %21 = vector.broadcast %20 : vector<1x32xf32> to vector<8x32xf32>
    %22 = arith.mulf %8, %21 : vector<8x32xf32>
    %23 = vector.broadcast %15 : vector<1x32xf32> to vector<8x32xf32>
    %24 = arith.addf %22, %23 : vector<8x32xf32>
    %c0_12 = arith.constant 0 : index
    %c0_13 = arith.constant 0 : index
    %25 = vector.load %arg2[%c0_12, %c0_13] : memref<32x12xf32, #tpu.memory_space<vmem>>, vector<32x12xf32>
    %cst_14 = arith.constant dense<0.000000e+00> : vector<8x12xf32>
    %26 = tpu.matmul %24, %25, %cst_14 {dimension_numbers = #tpu.dot_dimension_numbers<[1], [0], [0], [1], [0, 0, 1, 1], [], []>} : vector<8x32xf32>, vector<32x12xf32>, vector<8x12xf32> -> vector<8x12xf32>
    %27 = vector.broadcast %16 : vector<1x12xf32> to vector<8x12xf32>
    %28 = arith.addf %26, %27 : vector<8x12xf32>
    %29 = tpu.concatenate %24, %28 in 1 : vector<8x32xf32>, vector<8x12xf32> -> vector<8x44xf32>
    %c0_15 = arith.constant 0 : index
    %c0_16 = arith.constant 0 : index
    %30 = vector.load %arg4[%c0_15, %c0_16] : memref<8x44xf32, #tpu.memory_space<vmem>>, vector<8x44xf32>
    tpu.vector_store %arg4[%c0_15, %c0_16], %29 {strides = array<i32>} : memref<8x44xf32, #tpu.memory_space<vmem>>, vector<8x44xf32>,
    return
  }
}

</mosaic_0001>

<bundles_post_ra>
// kernel: class_block.1
= control target key start
LH: loop header
LB: loop body
LE: loop exit
PB: predicated region body
PF: predicated region fallthrough
CT: control target
= control target key end

     0   :  { %v281_v0 = vmov 0.0   ;;  %vm282_vm0 = vmmov 0   ;;  %vm26_vm1 = vcmask 523264   ;;  %vm100_vm2 = vcmask 261120   ;;  %s283_s18 = smov 32   ;;  %s364_s1 = inlined_call_operand.vmem [shape: f32[64,32], index: 1, kind: input, shape index: {}]   ;;  %s365_s0 = inlined_call_operand.vmem [shape: f32[8,64], index: 0, kind: input, shape index: {}]   ;;  %s366_s2 = inlined_call_operand.vmem [shape: f32[32,12], index: 2, kind: input, shape index: {}]   ;;  %s367_s3 = inlined_call_operand.vmem [shape: f32[3,32], index: 3, kind: input, shape index: {}]   ;;  %s368_s4 = inlined_call_operand.vmem [shape: f32[8,44], index: 4, kind: output, shape index: {}]  }
   0x1   :  { %246 = vmatprep.subr.mxu0 %v281_v0  ;;  %v25_v1 = vld [vmem:[%s364_s1 + $0x38] sm:$0xff]  ;;  %v24_v2 = vld [vmem:[%s364_s1 + $0x30] sm:$0xff]  ;;  %262 = vmatprep.mubr.msk.f32.mxu0 %vm282_vm0, %v281_v0  ;;  %v23_v3 = vld [vmem:[%s364_s1 + $0x28] sm:$0xff]  ;;  %v126_v35 = vlaneseq  ;;  %vm222_vm3 = vcmask 359424  }
   0x2   :  { %247 = vmatpush3.msra.mxu0 %v25_v1  ;;  %265 = vmatprep.subr.mxu1 %v281_v0  ;;  %v22_v4 = vld [vmem:[%s364_s1 + $0x20] sm:$0xff]  ;;  %v21_v5 = vld [vmem:[%s364_s1 + $0x18] sm:$0xff]  ;;  %v20_v6 = vld [vmem:[%s364_s1 + $0x10] sm:$0xff] }
   0x3   :  { %248 = vmatprep.subr.mxu0 %v281_v0  ;;  %273 = vmatprep.mubr.msk.f32.mxu1 %vm282_vm0, %v281_v0  ;;  %v19_v7 = vld [vmem:[%s364_s1 + $0x8] sm:$0xff]  ;;  %v18_v8 = vld [vmem:[%s364_s1] sm:$0xff]  ;;  %v139_v10 = vld [vmem:[%s366_s2 + $0x18] sm:$0xff]  ;;  %v127_v36 = vshrl.u32 %v126_v35, 7 }
   0x4   :  { %249 = vmatpush3.msra.mxu0 %v24_v2  ;;  %v17_v9 = vld [vmem:[%s365_s0] sm:$0xff]  ;;  %266 = vmatpush3.msra.mxu1 %v139_v10  ;;  %v138_v11 = vld [vmem:[%s366_s2 + $0x10] sm:$0xff]  ;;  %v137_v12 = vld [vmem:[%s366_s2 + $0x8] sm:$0xff] }
   0x5   :  { %250 = vmatprep.subr.mxu0 %v281_v0  ;;  %267 = vmatprep.subr.mxu1 %v281_v0  ;;  %v136_v13 = vld [vmem:[%s366_s2] sm:$0xff]  ;;  %v128_v38 = vsub.s32 0, %v127_v36 }
   0x6   :  { %251 = vmatpush3.msra.mxu0 %v23_v3  ;;  %268 = vmatpush3.msra.mxu1 %v138_v11  ;;  %v120_v37 = vld [vmem:[%s367_s3] sm:$0x1]  ;;  %v229_v42 = vld [vmem:[%s367_s3 + $0x1] ss:$0 sm:$0xff]  ;;  %v230_v45 = vld [vmem:[%s367_s3 + $0x2] ss:$0 sm:$0xff] }
   0x7   :  { %252 = vmatprep.subr.mxu0 %v281_v0  ;;  %269 = vmatprep.subr.mxu1 %v281_v0 }
   0x8   :  { %253 = vmatpush3.msra.mxu0 %v22_v4  ;;  %270 = vmatpush3.msra.mxu1 %v137_v12 }
   0x9   :  { %254 = vmatprep.subr.mxu0 %v281_v0  ;;  %271 = vmatprep.subr.mxu1 %v281_v0 }
   0xa   :  { %255 = vmatpush3.msra.mxu0 %v21_v5  ;;  %272 = vmatpush3.msra.mxu1 %v136_v13 }
   0xb   :  { %256 = vmatprep.subr.mxu0 %v281_v0 }
   0xc   :  { %257 = vmatpush3.msra.mxu0 %v20_v6 }
   0xd   :  { %258 = vmatprep.subr.mxu0 %v281_v0 }
   0xe   :  { %259 = vmatpush3.msra.mxu0 %v19_v7 }
   0xf   :  { %260 = vmatprep.subr.mxu0 %v281_v0 }
  0x10   :  { %261 = vmatpush3.msra.mxu0 %v18_v8 }
  0x11   :  { %263 = vmatmul.mubr.msk.f32.vlgmr.msra.gmra.mxu0 %vm26_vm1, %v17_v9 }
  0xd1   :  { %v96_v14 = vpop.f32.mrf.mxu0 }
  0xd2   :  { %v101_v15 = vsel %vm100_vm2, %v96_v14, 0.0 }
  0xd3   :  { %v102_v16 = vrot.slane %v101_v15, 4  ;;  %v264_v17 = vpop.f32.mrf.mxu0 }
  0xd5   :  { %v103_v18 = vadd.f32 %v102_v16, %v101_v15 }
  0xd7   :  { %v104_v19 = vrot.slane %v103_v18, 2 }
  0xd9   :  { %v105_v20 = vadd.f32 %v104_v19, %v103_v18 }
  0xdb   :  { %v106_v21 = vrot.slane %v105_v20, 1 }
  0xdd   :  { %v107_v22 = vadd.f32 %v106_v21, %v105_v20 }
  0xdf   :  { %v109_v23 = vmul.f32 0.125, %v107_v22 }
  0xe1   :  { %v110_v24 = vsub.f32 %v96_v14, %v109_v23 }
  0xe3   :  { %v111_v25 = vmul.f32 %v110_v24, %v110_v24 }
  0xe5   :  { %v112_v26 = vsel %vm100_vm2, %v111_v25, 0.0 }
  0xe6   :  { %v113_v27 = vrot.slane %v112_v26, 4 }
  0xe8   :  { %v114_v28 = vadd.f32 %v113_v27, %v112_v26 }
  0xea   :  { %v115_v29 = vrot.slane %v114_v28, 2 }
  0xec   :  { %v116_v30 = vadd.f32 %v115_v29, %v114_v28 }
  0xee   :  { %v117_v31 = vrot.slane %v116_v30, 1 }
  0xf0   :  { %v118_v32 = vadd.f32 %v117_v31, %v116_v30 }
  0xf2   :  { %v119_v33 = vmul.f32 0.125, %v118_v32 }
  0xf4   :  { %v123_v34 = vadd.f32 1e-05, %v119_v33 }
  0xf6   :  { %279 = vrsqrt.f32 %v123_v34 }
 0x103   :  { %v280_v39 = vpop.eup %279 }
 0x104   :  { %v125_v40 = vmul.f32 %v280_v39, %v120_v37 }
 0x106   :  { %v129_v41 = vrot.slane %v125_v40, %v128_v38 }
 0x108   :  { %v130_v43 = vmul.f32 %v129_v41, %v110_v24 }
 0x10a   :  { %v135_v44 = vadd.f32 %v229_v42, %v130_v43 }
 0x10c   :  { %274 = vmatmul.mubr.msk.f32.vlgmr.msra.gmra.mxu1 %vm100_vm2, %v135_v44 }
 0x1cc   :  { %v213_v46 = vpop.f32.mrf.mxu1 }
 0x1cd   :  { %v214_v47 = vadd.f32 %v230_v45, %v213_v46 }
 0x1ce   :  { %v275_v48 = vpop.f32.mrf.mxu1 }
 0x1cf   :  { %218 = vrot.lane.b32.xlu0 %v214_v47, %s283_s18 }
 0x241   :  { %v219_v49 = vpop.permute.xlu0 %218 }
 0x242   :  { %v221_v50 = vsel %vm100_vm2, %v135_v44, %v219_v49 }
 0x243   :  { %223 = vst.msk [vmem:[%s368_s4] sm:$0xff] %vm222_vm3, %v221_v50 }

</bundles_post_ra>
